<compile_context>
chip_gen: v6e
topology: v6e:2x2x1
jax: 0.10.0
libtpu: 0.0.40
codegen_flags: <defaults>
</compile_context>

<pallas_src>
import functools

import jax
import jax.numpy as jnp
from jax.experimental import pallas as pl
from jax.experimental.pallas import tpu as pltpu

NEG_SLOPE = 0.01  # PyTorch nn.LeakyReLU default negative_slope


def _round_up(n, m):
    return ((n + m - 1) // m) * m


def _qnetwork_kernel(x_ref, w_ref, b_ref, out_ref, *, layout):
    """Fused MLP forward over one batch tile.

    x_ref   : (TB, in_pad)  f32   batch tile of inputs
    w_ref   : (R, 128)      bf16  all weight blocks stacked on rows (VMEM-resident)
    b_ref   : (8, 128)      f32   one padded bias row per (layer, out-block)
    out_ref : (TB, 128)     f32   lane-dense padded output tile
    layout  : static nested tuple; per layer, per 128-wide output block:
              (bias_row, ((row_offset, rows), ...))  one entry per input block
    """
    b_all = b_ref[...]                                    # tiny bias slab, load once
    h_bf16 = [x_ref[...].astype(jnp.bfloat16)]            # activation blocks for the MXU
    last = len(layout) - 1
    final = None

    for li, layer in enumerate(layout):
        accs = []
        for bias_row, in_blks in layer:
            acc = b_all[bias_row:bias_row + 1, :]          # (1, 128) f32, broadcasts
            for (row_off, rows), hk in zip(in_blks, h_bf16):
                acc = acc + jnp.dot(hk, w_ref[row_off:row_off + rows, :],
                                    preferred_element_type=jnp.float32)
            if li != last:
                acc = jnp.maximum(acc, NEG_SLOPE * acc)    # LeakyReLU, f32 on the VPU
            accs.append(acc)
        if li != last:
            h_bf16 = [a.astype(jnp.bfloat16) for a in accs]
        else:
            final = accs

    out_ref[...] = final[0]                                # output_dim <= 128 -> one block


def pack_qnetwork_params(params):
    """One-time packing (call at init, NOT per forward call).

    Splits layers wider/deeper than 128 into 128-wide column / 128-deep row
    blocks, zero-pads every block to 128 lanes, stacks all blocks row-wise into
    one bf16 slab and all biases into one (8, 128) f32 slab.  Returns device
    arrays plus a static, hashable `layout` describing where each block lives.
    """
    out_dim = params[-1][0].shape[1]
    assert out_dim <= 128, "TODO(synk): multi-block output store for output_dim > 128"

    in_pad0 = _round_up(params[0][0].shape[0], 16)         # bf16 sublane alignment
    w_blocks, b_rows, layer_layouts = [], [], []
    row_off = 0
    n_prev_blocks = None

    for li, (w, b) in enumerate(params):
        fan_in, fan_out = w.shape
        in_chunks = [in_pad0] if li == 0 else [128] * n_prev_blocks
        n_out = _round_up(fan_out, 128) // 128
        w_p = jnp.pad(w.astype(jnp.float32),
                      ((0, sum(in_chunks) - fan_in), (0, n_out * 128 - fan_out)))
        b_p = jnp.pad(b.astype(jnp.float32), (0, n_out * 128 - fan_out))

        out_blks = []
        for j in range(n_out):
            in_entries = []
            r = 0
            for rows in in_chunks:
                w_blocks.append(
                    w_p[r:r + rows, j * 128:(j + 1) * 128].astype(jnp.bfloat16))
                in_entries.append((row_off, rows))
                row_off += rows
                r += rows
            out_blks.append((len(b_rows), tuple(in_entries)))
            b_rows.append(b_p[j * 128:(j + 1) * 128])
        layer_layouts.append(tuple(out_blks))
        n_prev_blocks = n_out

    w_slab = jnp.concatenate(w_blocks, axis=0)              # (R, 128) bf16
    nb = _round_up(len(b_rows), 8)
    b_slab = jnp.zeros((nb, 128), jnp.float32).at[:len(b_rows)].set(jnp.stack(b_rows))

    return w_slab, b_slab, tuple(layer_layouts), in_pad0, out_dim


@functools.partial(jax.jit, static_argnames=("layout", "in_pad0", "out_dim"))
def qnetwork_forward(x, w_slab, b_slab, *, layout, in_pad0, out_dim):
    """x: (batch, input_dim) f32.  Returns (batch, output_dim) f32."""
    batch, input_dim = x.shape

    # Batch tile: multiple of 16 (bf16 sublane packing); >=256 fills the
    # 256-wide MXU M dim on v6e/v7x; 512 amortizes the ~0.35 us/step grid
    # overhead while staying tiny vs. v7x's 32 MiB scoped VMEM.
    b16 = _round_up(batch, 16)
    tb = b16 if b16 <= 256 else (512 if b16 >= 512 else 256)
    b_total = _round_up(batch, tb)

    x_p = jnp.pad(x.astype(jnp.float32),
                  ((0, b_total - batch), (0, in_pad0 - input_dim)))

    kernel = functools.partial(_qnetwork_kernel, layout=layout)
    out_pad = pl.pallas_call(
        kernel,
        out_shape=jax.ShapeDtypeStruct((b_total, 128), jnp.float32),
        grid_spec=pltpu.PrefetchScalarGridSpec(
            num_scalar_prefetch=0,
            grid=(b_total // tb,),
            in_specs=[
                pl.BlockSpec((tb, in_pad0), lambda i: (i, 0)),
                # Constant block index -> weight/bias slabs stay VMEM-resident
                # across grid steps (no re-DMA per batch tile).
                pl.BlockSpec(w_slab.shape, lambda i: (0, 0)),
                pl.BlockSpec(b_slab.shape, lambda i: (0, 0)),
            ],
            out_specs=pl.BlockSpec((tb, 128), lambda i: (i, 0)),
        ),
        compiler_params=pltpu.CompilerParams(
            dimension_semantics=("parallel",)),
    )(x_p, w_slab, b_slab)

    # Padded rows/columns are exactly zero-derived; slice real outputs outside.
    return out_pad[:batch, :out_dim]


def init_params(key, input_dim, output_dim):
    """Deterministic init mirroring PyTorch Linear shapes (stored transposed)."""
    dims = [input_dim, 64, 128, 256, 32, output_dim]
    params = []
    for i in range(len(dims) - 1):
        fan_in, fan_out = dims[i], dims[i + 1]
        key, kw, kb = jax.random.split(key, 3)
        bound = 1.0 / jnp.sqrt(fan_in)
        w = jax.random.uniform(kw, (fan_in, fan_out), jnp.float32, -bound, bound)
        b = jax.random.uniform(kb, (fan_out,), jnp.float32, -bound, bound)
        params.append((w, b))
    return params


def reference_forward(x, params):
    h = x
    for i, (w, b) in enumerate(params):
        h = h @ w + b
        if i < len(params) - 1:
            h = jnp.where(h > 0, h, NEG_SLOPE * h)
    return h


if __name__ == "__main__":
    key = jax.random.PRNGKey(0)
    batch, input_dim, output_dim = 8, 16, 4

    key, kx = jax.random.split(key)
    x = jax.random.normal(kx, (batch, input_dim), jnp.float32)
    params = init_params(key, input_dim, output_dim)

    # One-time packing at init (not per forward call).
    w_slab, b_slab, layout, in_pad0, out_dim = pack_qnetwork_params(params)

    out = qnetwork_forward(x, w_slab, b_slab,
                           layout=layout, in_pad0=in_pad0, out_dim=out_dim)
    out = jax.block_until_ready(out)
    ref = reference_forward(x, params)
    assert out.shape == (batch, output_dim)
    # bf16 weights/activations on the MXU (f32 accumulate) => loosened tolerance.
    assert jnp.allclose(out, ref, atol=5e-2, rtol=5e-2), "mismatch vs reference"

    # Also exercise the batched-grid path (multiple batch tiles, parallel axis).
    xb = jax.random.normal(jax.random.PRNGKey(1), (384, input_dim), jnp.float32)
    outb = jax.block_until_ready(
        qnetwork_forward(xb, w_slab, b_slab,
                         layout=layout, in_pad0=in_pad0, out_dim=out_dim))
    refb = reference_forward(xb, params)
    assert outb.shape == (384, output_dim)
    assert jnp.allclose(outb, refb, atol=5e-2, rtol=5e-2), "mismatch (batched grid)"

    print("KERNEL_OK")
</pallas_src>

<mosaic_0001>
module attributes {stable_mosaic.version = 11 : i64} {
  func.func @_qnetwork_kernel(%arg0: i32, %arg1: memref<16x16xf32, #tpu.memory_space<vmem>>, %arg2: memref<784x128xbf16, #tpu.memory_space<vmem>>, %arg3: memref<8x128xf32, #tpu.memory_space<vmem>>, %arg4: memref<16x128xf32, #tpu.memory_space<vmem>>) attributes {dimension_semantics = [#tpu.dimension_semantics<parallel>], iteration_bounds = array<i64: 1>, scalar_prefetch = 0 : i64, scratch_operands = 0 : i64, tpu.core_type = #tpu.core_type<tc>, window_params = [{transform_indices = @transform_0, window_bounds = array<i64: 16, 16>}, {pipeline_mode = #tpu.pipeline_mode<synchronous>, transform_indices = @transform_1, window_bounds = array<i64: 784, 128>}, {pipeline_mode = #tpu.pipeline_mode<synchronous>, transform_indices = @transform_2, window_bounds = array<i64: 8, 128>}, {transform_indices = @transform_3, window_bounds = array<i64: 16, 128>}]} {
    %c0 = arith.constant 0 : index
    %c0_0 = arith.constant 0 : index
    %0 = vector.load %arg3[%c0, %c0_0] : memref<8x128xf32, #tpu.memory_space<vmem>>, vector<8x128xf32>
    %c0_1 = arith.constant 0 : index
    %c0_2 = arith.constant 0 : index
    %1 = vector.load %arg1[%c0_1, %c0_2] : memref<16x16xf32, #tpu.memory_space<vmem>>, vector<16x16xf32>
    %2 = arith.truncf %1 : vector<16x16xf32> to vector<16x16xbf16>
    %3 = vector.extract_strided_slice %0 {offsets = [0, 0], sizes = [1, 128], strides = [1, 1]} : vector<8x128xf32> to vector<1x128xf32>
    %c0_3 = arith.constant 0 : index
    %c0_4 = arith.constant 0 : index
    %4 = vector.load %arg2[%c0_3, %c0_4] : memref<784x128xbf16, #tpu.memory_space<vmem>>, vector<16x128xbf16>
    %cst = arith.constant dense<0.000000e+00> : vector<16x128xf32>
    %5 = tpu.matmul %2, %4, %cst {dimension_numbers = #tpu.dot_dimension_numbers<[1], [0], [0], [1], [0, 0, 1, 1], [], []>} : vector<16x16xbf16>, vector<16x128xbf16>, vector<16x128xf32> -> vector<16x128xf32>
    %6 = vector.broadcast %3 : vector<1x128xf32> to vector<16x128xf32>
    %7 = arith.addf %6, %5 : vector<16x128xf32>
    %cst_5 = arith.constant 0.00999999977 : f32
    %8 = vector.broadcast %cst_5 : f32 to vector<16x128xf32>
    %9 = arith.mulf %8, %7 : vector<16x128xf32>
    %10 = arith.maximumf %7, %9 : vector<16x128xf32>
    %11 = arith.truncf %10 : vector<16x128xf32> to vector<16x128xbf16>
    %12 = vector.extract_strided_slice %0 {offsets = [1, 0], sizes = [1, 128], strides = [1, 1]} : vector<8x128xf32> to vector<1x128xf32>
    %c16 = arith.constant 16 : index
    %c0_6 = arith.constant 0 : index
    %13 = vector.load %arg2[%c16, %c0_6] : memref<784x128xbf16, #tpu.memory_space<vmem>>, vector<128x128xbf16>
    %cst_7 = arith.constant dense<0.000000e+00> : vector<16x128xf32>
    %14 = tpu.matmul %11, %13, %cst_7 {dimension_numbers = #tpu.dot_dimension_numbers<[1], [0], [0], [1], [0, 0, 1, 1], [], []>} : vector<16x128xbf16>, vector<128x128xbf16>, vector<16x128xf32> -> vector<16x128xf32>
    %15 = vector.broadcast %12 : vector<1x128xf32> to vector<16x128xf32>
    %16 = arith.addf %15, %14 : vector<16x128xf32>
    %cst_8 = arith.constant 0.00999999977 : f32
    %17 = vector.broadcast %cst_8 : f32 to vector<16x128xf32>
    %18 = arith.mulf %17, %16 : vector<16x128xf32>
    %19 = arith.maximumf %16, %18 : vector<16x128xf32>
    %20 = arith.truncf %19 : vector<16x128xf32> to vector<16x128xbf16>
    %21 = vector.extract_strided_slice %0 {offsets = [2, 0], sizes = [1, 128], strides = [1, 1]} : vector<8x128xf32> to vector<1x128xf32>
    %c144 = arith.constant 144 : index
    %c0_9 = arith.constant 0 : index
    %22 = vector.load %arg2[%c144, %c0_9] : memref<784x128xbf16, #tpu.memory_space<vmem>>, vector<128x128xbf16>
    %cst_10 = arith.constant dense<0.000000e+00> : vector<16x128xf32>
    %23 = tpu.matmul %20, %22, %cst_10 {dimension_numbers = #tpu.dot_dimension_numbers<[1], [0], [0], [1], [0, 0, 1, 1], [], []>} : vector<16x128xbf16>, vector<128x128xbf16>, vector<16x128xf32> -> vector<16x128xf32>
    %24 = vector.broadcast %21 : vector<1x128xf32> to vector<16x128xf32>
    %25 = arith.addf %24, %23 : vector<16x128xf32>
    %cst_11 = arith.constant 0.00999999977 : f32
    %26 = vector.broadcast %cst_11 : f32 to vector<16x128xf32>
    %27 = arith.mulf %26, %25 : vector<16x128xf32>
    %28 = arith.maximumf %25, %27 : vector<16x128xf32>
    %29 = vector.extract_strided_slice %0 {offsets = [3, 0], sizes = [1, 128], strides = [1, 1]} : vector<8x128xf32> to vector<1x128xf32>
    %c272 = arith.constant 272 : index
    %c0_12 = arith.constant 0 : index
    %30 = vector.load %arg2[%c272, %c0_12] : memref<784x128xbf16, #tpu.memory_space<vmem>>, vector<128x128xbf16>
    %cst_13 = arith.constant dense<0.000000e+00> : vector<16x128xf32>
    %31 = tpu.matmul %20, %30, %cst_13 {dimension_numbers = #tpu.dot_dimension_numbers<[1], [0], [0], [1], [0, 0, 1, 1], [], []>} : vector<16x128xbf16>, vector<128x128xbf16>, vector<16x128xf32> -> vector<16x128xf32>
    %32 = vector.broadcast %29 : vector<1x128xf32> to vector<16x128xf32>
    %33 = arith.addf %32, %31 : vector<16x128xf32>
    %cst_14 = arith.constant 0.00999999977 : f32
    %34 = vector.broadcast %cst_14 : f32 to vector<16x128xf32>
    %35 = arith.mulf %34, %33 : vector<16x128xf32>
    %36 = arith.maximumf %33, %35 : vector<16x128xf32>
    %37 = arith.truncf %28 : vector<16x128xf32> to vector<16x128xbf16>
    %38 = arith.truncf %36 : vector<16x128xf32> to vector<16x128xbf16>
    %39 = vector.extract_strided_slice %0 {offsets = [4, 0], sizes = [1, 128], strides = [1, 1]} : vector<8x128xf32> to vector<1x128xf32>
    %c400 = arith.constant 400 : index
    %c0_15 = arith.constant 0 : index
    %40 = vector.load %arg2[%c400, %c0_15] : memref<784x128xbf16, #tpu.memory_space<vmem>>, vector<128x128xbf16>
    %cst_16 = arith.constant dense<0.000000e+00> : vector<16x128xf32>
    %41 = tpu.matmul %37, %40, %cst_16 {dimension_numbers = #tpu.dot_dimension_numbers<[1], [0], [0], [1], [0, 0, 1, 1], [], []>} : vector<16x128xbf16>, vector<128x128xbf16>, vector<16x128xf32> -> vector<16x128xf32>
    %42 = vector.broadcast %39 : vector<1x128xf32> to vector<16x128xf32>
    %43 = arith.addf %42, %41 : vector<16x128xf32>
    %c528 = arith.constant 528 : index
    %c0_17 = arith.constant 0 : index
    %44 = vector.load %arg2[%c528, %c0_17] : memref<784x128xbf16, #tpu.memory_space<vmem>>, vector<128x128xbf16>
    %cst_18 = arith.constant dense<0.000000e+00> : vector<16x128xf32>
    %45 = tpu.matmul %38, %44, %cst_18 {dimension_numbers = #tpu.dot_dimension_numbers<[1], [0], [0], [1], [0, 0, 1, 1], [], []>} : vector<16x128xbf16>, vector<128x128xbf16>, vector<16x128xf32> -> vector<16x128xf32>
    %46 = arith.addf %43, %45 : vector<16x128xf32>
    %cst_19 = arith.constant 0.00999999977 : f32
    %47 = vector.broadcast %cst_19 : f32 to vector<16x128xf32>
    %48 = arith.mulf %47, %46 : vector<16x128xf32>
    %49 = arith.maximumf %46, %48 : vector<16x128xf32>
    %50 = arith.truncf %49 : vector<16x128xf32> to vector<16x128xbf16>
    %51 = vector.extract_strided_slice %0 {offsets = [5, 0], sizes = [1, 128], strides = [1, 1]} : vector<8x128xf32> to vector<1x128xf32>
    %c656 = arith.constant 656 : index
    %c0_20 = arith.constant 0 : index
    %52 = vector.load %arg2[%c656, %c0_20] : memref<784x128xbf16, #tpu.memory_space<vmem>>, vector<128x128xbf16>
    %cst_21 = arith.constant dense<0.000000e+00> : vector<16x128xf32>
    %53 = tpu.matmul %50, %52, %cst_21 {dimension_numbers = #tpu.dot_dimension_numbers<[1], [0], [0], [1], [0, 0, 1, 1], [], []>} : vector<16x128xbf16>, vector<128x128xbf16>, vector<16x128xf32> -> vector<16x128xf32>
    %54 = vector.broadcast %51 : vector<1x128xf32> to vector<16x128xf32>
    %55 = arith.addf %54, %53 : vector<16x128xf32>
    %c0_22 = arith.constant 0 : index
    %c0_23 = arith.constant 0 : index
    %56 = vector.load %arg4[%c0_22, %c0_23] : memref<16x128xf32, #tpu.memory_space<vmem>>, vector<16x128xf32>
    tpu.vector_store %arg4[%c0_22, %c0_23], %55 {strides = array<i32>} : memref<16x128xf32, #tpu.memory_space<vmem>>, vector<16x128xf32>,
    return
  }
  func.func @transform_0(%arg0: i32) -> (i32, i32) {
    %c0_i32 = arith.constant 0 : i32
    %c0_i32_0 = arith.constant 0 : i32
    return %arg0, %c0_i32 : i32, i32
  }
  func.func @transform_1(%arg0: i32) -> (i32, i32) {
    %c0_i32 = arith.constant 0 : i32
    %c0_i32_0 = arith.constant 0 : i32
    %c0_i32_1 = arith.constant 0 : i32
    return %c0_i32, %c0_i32_0 : i32, i32
  }
  func.func @transform_2(%arg0: i32) -> (i32, i32) {
    %c0_i32 = arith.constant 0 : i32
    %c0_i32_0 = arith.constant 0 : i32
    %c0_i32_1 = arith.constant 0 : i32
    return %c0_i32, %c0_i32_0 : i32, i32
  }
  func.func @transform_3(%arg0: i32) -> (i32, i32) {
    %c0_i32 = arith.constant 0 : i32
    %c0_i32_0 = arith.constant 0 : i32
    return %arg0, %c0_i32 : i32, i32
  }
}

</mosaic_0001>

<bundles_post_ra>
// kernel: qnetwork_forward.1
= control target key start
LH: loop header
LB: loop body
LE: loop exit
PB: predicated region body
PF: predicated region fallthrough
CT: control target
= control target key end

     0   :  { %8 = vsyncpa [#allocation3], 0  ;;  %s1094_s12 = smov [#allocation2]   ;;  %s1216_s0 = inlined_call_operand.vmem [shape: f32[16,16], index: 0, kind: input, shape index: {}]   ;;  %s1217_s1 = inlined_call_operand.hbm [shape: bf16[784,128], index: 1, kind: input, shape index: {}]   ;;  %s1218_s2 = inlined_call_operand.vmem [shape: f32[8,128], index: 2, kind: input, shape index: {}]   ;;  %s1219_s3 = inlined_call_operand.vmem [shape: f32[16,128], index: 3, kind: output, shape index: {}]  }
   0x1   :  { %s16_s13 = sshll.u32 %s1094_s12, 4  ;;  %s17_s13 = int_to_ptr.vmem [resolvable:$true] %s16_s13 }
   0x2   :  { %s1080_s14 = scalar_lea.vmem %s17_s13, 6272  ;;  %p1085_p1 = scmp.lt.s32.totalorder %s17_s13, %s17_s13 }
   0x3   :  { %p1081_p0 = scmp.ne.s32.totalorder %s17_s13, %s1080_s14  ;;  %p1086_p2 = scmp.lt.s32.totalorder %s1080_s14, %s1080_s14 }
   0x5   :  { %p1087_p3 = por %p1086_p2, %p1085_p1 }
   0x7   :  { %p1088_p4 = pnand %p1087_p3, %p1081_p0 }
   0x9   :  { %1091 = shalt.err (!%p1088_p4)
}
   0xa   :  { %s1095_s15 = smov 64   ;;  %s1096_s16 = smov 4  }
   0xb   :  { %22 = dma.hbm_to_vmem [thread:$0]  %s1217_s1, 6272, %s17_s13, [#allocation3], %s1095_s15, %s1095_s15, %s1096_s16  }
   0xc   :  { %1092 = dma.done.wait [#allocation3], 6272  }
   0xd   :  { %1093 = vsyncadd [#allocation3], 4294961024  ;;  %v1097_v0 = vmov 0.0   ;;  %vm1098_vm0 = vmmov 0   ;;  %v1023_v1 = vld [vmem:[#allocation2] sm:$0xff]   ;;  %v31_v3 = vld [vmem:[%s1216_s0 + $0x8] sm:$0xff]  ;;  %v86_v18 = vlaneseq }
   0xe   :  { %892 = vmatprep.subr.bf16.mxu0 %v1097_v0  ;;  %894 = vmatprep.mubr.msk.bf16.mxu0 %vm1098_vm0, %v1097_v0  ;;  %v30_v2 = vld [vmem:[%s1216_s0] sm:$0xff]  ;;  %vm41_vm1 = vcmask 130048   ;;  %v1025_v6 = vld [vmem:[#allocation2 + $0x38] sm:$0xff]   ;;  %v1026_v7 = vld [vmem:[#allocation2 + $0x30] sm:$0xff]  }
   0xf   :  { %898 = vmatprep.subr.bf16.mxu1 %v1097_v0  ;;  %914 = vmatprep.mubr.msk.bf16.mxu1 %vm1098_vm0, %v1097_v0  ;;  %v32_v4 = vpack.c.bf16 %v31_v3, %v30_v2  ;;  %v1024_v5 = vld [vmem:[#allocation2 + $0x40] sm:$0xff]   ;;  %v1027_v8 = vld [vmem:[#allocation2 + $0x28] sm:$0xff]   ;;  %v1029_v10 = vld [vmem:[#allocation2 + $0x18] sm:$0xff]   ;;  %v1150_v19 = vshrl.u32 %v86_v18, 7 }
  0x10   :  { %893 = vmatpush3.bf16.msra.mxu0 %v1023_v1  ;;  %899 = vmatpush3.bf16.msra.mxu1 %v1024_v5  ;;  %v1028_v9 = vld [vmem:[#allocation2 + $0x20] sm:$0xff]   ;;  %v1030_v11 = vld [vmem:[#allocation2 + $0x10] sm:$0xff]   ;;  %v1031_v12 = vld [vmem:[#allocation2 + $0x8] sm:$0xff]  }
  0x11   :  { %918 = vmatprep.subr.bf16.mxu0 %v1097_v0  ;;  %900 = vmatprep.subr.bf16.mxu1 %v1097_v0  ;;  %v1032_v13 = vld [vmem:[#allocation2 + $0x80] sm:$0xff]   ;;  %v1034_v14 = vld [vmem:[#allocation2 + $0x78] sm:$0xff]   ;;  %v1036_v15 = vld [vmem:[#allocation2 + $0x70] sm:$0xff]   ;;  %v88_v20 = vsub.s32 0, %v1150_v19  ;;  %v204_v45 = vsub.s32 1, %v1150_v19 }
  0x12   :  { %v1038_v16 = vld [vmem:[#allocation2 + $0x68] sm:$0xff]   ;;  %v1040_v17 = vld [vmem:[#allocation2 + $0x60] sm:$0xff]   ;;  %v1035_v35 = vld [vmem:[#allocation2 + $0xb8] sm:$0xff]  }
  0x13   :  { %895 = vmatmul.mubr.msk.bf16.vlgmr.msra.gmra.mxu0 %vm41_vm1, %v32_v4  ;;  %v1156_v21 = vld [vmem:[%s1218_s2] sm:$0xff]  ;;  %v1037_v36 = vld [vmem:[#allocation2 + $0xb0] sm:$0xff]   ;;  %v1039_v37 = vld [vmem:[#allocation2 + $0xa8] sm:$0xff]  }
  0x14   :  { %934 = vmatprep.mubr.msk.bf16.mxu0 %vm1098_vm0, %v1097_v0  ;;  %901 = vmatpush3.bf16.msra.mxu1 %v1025_v6  ;;  %v89_v22 = vrot.slane %v1156_v21, %v88_v20  ;;  %v1033_v33 = vld [vmem:[#allocation2 + $0xc0] sm:$0xff]   ;;  %v1042_v39 = vld [vmem:[#allocation2 + $0x58] sm:$0xff]   ;;  %v1044_v41 = vld [vmem:[#allocation2 + $0x50] sm:$0xff]   ;;  %v205_v46 = vrot.slane %v1156_v21, %v204_v45 }
  0x15   :  { %902 = vmatprep.subr.bf16.mxu1 %v1097_v0  ;;  %919 = vmatpush3.bf16.msra.mxu0 %v1032_v13  ;;  %v1041_v38 = vld [vmem:[#allocation2 + $0xa0] sm:$0xff]   ;;  %v1043_v40 = vld [vmem:[#allocation2 + $0x98] sm:$0xff]   ;;  %v1045_v42 = vld [vmem:[#allocation2 + $0x90] sm:$0xff]  }
  0x16   :  { %920 = vmatprep.subr.bf16.mxu0 %v1097_v0  ;;  %v1046_v43 = vld [vmem:[#allocation2 + $0x48] sm:$0xff]   ;;  %v1048_v57 = vld [vmem:[#allocation2 + $0x100] sm:$0xff]   ;;  %v1050_v60 = vld [vmem:[#allocation2 + $0xf8] sm:$0xff]  }
  0x17   :  { %v1047_v44 = vld [vmem:[#allocation2 + $0x88] sm:$0xff]   ;;  %v1049_v58 = vld [vmem:[#allocation2 + $0x140] sm:$0xff]   ;;  %v1051_v61 = vld [vmem:[#allocation2 + $0x138] sm:$0xff]  }
  0x18   :  { %903 = vmatpush3.bf16.msra.mxu1 %v1026_v7  ;;  %v1052_v62 = vld [vmem:[#allocation2 + $0xf0] sm:$0xff]   ;;  %v1054_v1 = vld [vmem:[#allocation2 + $0xe8] sm:$0xff]   ;;  %v1056_v3 = vld [vmem:[#allocation2 + $0xe0] sm:$0xff]  }
  0x19   :  { %904 = vmatprep.subr.bf16.mxu1 %v1097_v0  ;;  %921 = vmatpush3.bf16.msra.mxu0 %v1034_v14  ;;  %v1053_v63 = vld [vmem:[#allocation2 + $0x130] sm:$0xff]   ;;  %v1055_v2 = vld [vmem:[#allocation2 + $0x128] sm:$0xff]   ;;  %v1057_v4 = vld [vmem:[#allocation2 + $0x120] sm:$0xff]  }
  0x1a   :  { %922 = vmatprep.subr.bf16.mxu0 %v1097_v0  ;;  %v1058_v5 = vld [vmem:[#allocation2 + $0xd8] sm:$0xff]   ;;  %v1060_v7 = vld [vmem:[#allocation2 + $0xd0] sm:$0xff]  }
  0x1b   :  { %v1059_v6 = vld [vmem:[#allocation2 + $0x118] sm:$0xff]   ;;  %v1070_v45 = vld [vmem:[#allocation2 + $0x150] sm:$0xff]  }
  0x1c   :  { %905 = vmatpush3.bf16.msra.mxu1 %v1027_v8  ;;  %v1061_v8 = vld [vmem:[#allocation2 + $0x110] sm:$0xff]  }
  0x1d   :  { %906 = vmatprep.subr.bf16.mxu1 %v1097_v0  ;;  %923 = vmatpush3.bf16.msra.mxu0 %v1036_v15 }
  0x1e   :  { %924 = vmatprep.subr.bf16.mxu0 %v1097_v0 }
  0x20   :  { %907 = vmatpush3.bf16.msra.mxu1 %v1028_v9  ;;  %v1062_v9 = vld [vmem:[#allocation2 + $0xc8] sm:$0xff]  }
  0x21   :  { %908 = vmatprep.subr.bf16.mxu1 %v1097_v0  ;;  %925 = vmatpush3.bf16.msra.mxu0 %v1038_v16 }
  0x22   :  { %926 = vmatprep.subr.bf16.mxu0 %v1097_v0 }
  0x24   :  { %909 = vmatpush3.bf16.msra.mxu1 %v1029_v10  ;;  %v1063_v10 = vld [vmem:[#allocation2 + $0x108] sm:$0xff]  }
  0x25   :  { %910 = vmatprep.subr.bf16.mxu1 %v1097_v0  ;;  %927 = vmatpush3.bf16.msra.mxu0 %v1040_v17 }
  0x26   :  { %928 = vmatprep.subr.bf16.mxu0 %v1097_v0 }
  0x28   :  { %911 = vmatpush3.bf16.msra.mxu1 %v1030_v11  ;;  %v320_v11 = vsub.s32 2, %v1150_v19 }
  0x29   :  { %912 = vmatprep.subr.bf16.mxu1 %v1097_v0  ;;  %929 = vmatpush3.bf16.msra.mxu0 %v1042_v39 }
  0x2a   :  { %930 = vmatprep.subr.bf16.mxu0 %v1097_v0  ;;  %v321_v13 = vrot.slane %v1156_v21, %v320_v11 }
  0x2c   :  { %913 = vmatpush3.bf16.msra.mxu1 %v1031_v12  ;;  %v435_v12 = vsub.s32 3, %v1150_v19 }
  0x2d   :  { %938 = vmatprep.subr.bf16.mxu1 %v1097_v0  ;;  %931 = vmatpush3.bf16.msra.mxu0 %v1044_v41  ;;  %v1066_v41 = vld [vmem:[#allocation2 + $0x170] sm:$0xff]  }
  0x2e   :  { %932 = vmatprep.subr.bf16.mxu0 %v1097_v0  ;;  %v436_v14 = vrot.slane %v1156_v21, %v435_v12 }
  0x31   :  { %933 = vmatpush3.bf16.msra.mxu0 %v1046_v43  ;;  %v1068_v43 = vld [vmem:[#allocation2 + $0x160] sm:$0xff]  }
  0x32   :  { %958 = vmatprep.subr.bf16.mxu0 %v1097_v0 }
  0xd3   :  { %v79_v23 = vpop.f32.mrf.mxu0 }
  0xd4   :  { %v90_v24 = vadd.f32 %v89_v22, %v79_v23 }
  0xd5   :  { %v896_v25 = vpop.f32.mrf.mxu0 }
  0xd6   :  { %v92_v27 = vmul.f32 0.01, %v90_v24 }
  0xd7   :  { %v82_v26 = vpop.f32.mrf.mxu0 }
  0xd8   :  { %v91_v28 = vadd.f32 %v89_v22, %v82_v26  ;;  %v94_v31 = vmax.f32 %v90_v24, %v92_v27 }
  0xd9   :  { %v897_v29 = vpop.f32.mrf.mxu0 }
  0xda   :  { %v93_v30 = vmul.f32 0.01, %v91_v28 }
  0xdc   :  { %v95_v32 = vmax.f32 %v91_v28, %v93_v30 }
  0xde   :  { %v96_v34 = vpack.c.bf16 %v95_v32, %v94_v31 }
  0xe0   :  { %915 = vmatmul.mubr.bf16.vlgmr.msra.gmra.mxu1 %v96_v34 }
  0xe1   :  { %939 = vmatpush3.bf16.msra.mxu1 %v1033_v33  ;;  %954 = vmatprep.mubr.msk.bf16.mxu1 %vm1098_vm0, %v1097_v0 }
  0xe2   :  { %940 = vmatprep.subr.bf16.mxu1 %v1097_v0 }
  0xe5   :  { %941 = vmatpush3.bf16.msra.mxu1 %v1035_v35 }
  0xe6   :  { %942 = vmatprep.subr.bf16.mxu1 %v1097_v0 }
  0xe9   :  { %943 = vmatpush3.bf16.msra.mxu1 %v1037_v36 }
  0xea   :  { %944 = vmatprep.subr.bf16.mxu1 %v1097_v0 }
  0xed   :  { %945 = vmatpush3.bf16.msra.mxu1 %v1039_v37  ;;  %v1064_v37 = vld [vmem:[#allocation2 + $0x180] sm:$0xff]  }
  0xee   :  { %946 = vmatprep.subr.bf16.mxu1 %v1097_v0 }
  0xf1   :  { %947 = vmatpush3.bf16.msra.mxu1 %v1041_v38 }
  0xf2   :  { %948 = vmatprep.subr.bf16.mxu1 %v1097_v0 }
  0xf5   :  { %949 = vmatpush3.bf16.msra.mxu1 %v1043_v40  ;;  %v1065_v40 = vld [vmem:[#allocation2 + $0x178] sm:$0xff]  }
  0xf6   :  { %950 = vmatprep.subr.bf16.mxu1 %v1097_v0 }
  0xf9   :  { %951 = vmatpush3.bf16.msra.mxu1 %v1045_v42  ;;  %v1067_v42 = vld [vmem:[#allocation2 + $0x168] sm:$0xff]  }
  0xfa   :  { %952 = vmatprep.subr.bf16.mxu1 %v1097_v0 }
  0xfd   :  { %953 = vmatpush3.bf16.msra.mxu1 %v1047_v44  ;;  %v1069_v44 = vld [vmem:[#allocation2 + $0x158] sm:$0xff]  }
  0xfe   :  { %978 = vmatprep.subr.bf16.mxu1 %v1097_v0 }
 0x1a0   :  { %v195_v47 = vpop.f32.mrf.mxu1 }
 0x1a1   :  { %v206_v48 = vadd.f32 %v205_v46, %v195_v47  ;;  %v552_v47 = vsub.s32 4, %v1150_v19 }
 0x1a2   :  { %v916_v49 = vpop.f32.mrf.mxu1 }
 0x1a3   :  { %v208_v51 = vmul.f32 0.01, %v206_v48 }
 0x1a4   :  { %v198_v50 = vpop.f32.mrf.mxu1 }
 0x1a5   :  { %v207_v52 = vadd.f32 %v205_v46, %v198_v50  ;;  %v210_v55 = vmax.f32 %v206_v48, %v208_v51  ;;  %v1071_v46 = vld [vmem:[#allocation2 + $0x148] sm:$0xff]   ;;  %v553_v48 = vrot.slane %v1156_v21, %v552_v47 }
 0x1a6   :  { %v917_v53 = vpop.f32.mrf.mxu1 }
 0x1a7   :  { %v209_v54 = vmul.f32 0.01, %v207_v52 }
 0x1a9   :  { %v211_v56 = vmax.f32 %v207_v52, %v209_v54 }
 0x1ab   :  { %v212_v59 = vpack.c.bf16 %v211_v56, %v210_v55 }
 0x1ad   :  { %935 = vmatmul.mubr.bf16.vlgmr.msra.gmra.mxu0 %v212_v59  ;;  %955 = vmatmul.mubr.bf16.vlgmr.msra.gmra.mxu1 %v212_v59 }
 0x1ae   :  { %959 = vmatpush3.bf16.msra.mxu0 %v1048_v57  ;;  %979 = vmatpush3.bf16.msra.mxu1 %v1049_v58 }
 0x1af   :  { %960 = vmatprep.subr.bf16.mxu0 %v1097_v0  ;;  %980 = vmatprep.subr.bf16.mxu1 %v1097_v0 }
 0x1b0   :  { %974 = vmatprep.mubr.msk.bf16.mxu0 %vm1098_vm0, %v1097_v0  ;;  %994 = vmatprep.mubr.msk.bf16.mxu1 %vm1098_vm0, %v1097_v0 }
 0x1b2   :  { %961 = vmatpush3.bf16.msra.mxu0 %v1050_v60  ;;  %981 = vmatpush3.bf16.msra.mxu1 %v1051_v61 }
 0x1b3   :  { %962 = vmatprep.subr.bf16.mxu0 %v1097_v0  ;;  %982 = vmatprep.subr.bf16.mxu1 %v1097_v0 }
 0x1b6   :  { %963 = vmatpush3.bf16.msra.mxu0 %v1052_v62  ;;  %983 = vmatpush3.bf16.msra.mxu1 %v1053_v63 }
 0x1b7   :  { %964 = vmatprep.subr.bf16.mxu0 %v1097_v0  ;;  %984 = vmatprep.subr.bf16.mxu1 %v1097_v0 }
 0x1ba   :  { %965 = vmatpush3.bf16.msra.mxu0 %v1054_v1  ;;  %985 = vmatpush3.bf16.msra.mxu1 %v1055_v2  ;;  %v775_v2 = vsub.s32 5, %v1150_v19 }
 0x1bb   :  { %966 = vmatprep.subr.bf16.mxu0 %v1097_v0  ;;  %986 = vmatprep.subr.bf16.mxu1 %v1097_v0 }
 0x1be   :  { %967 = vmatpush3.bf16.msra.mxu0 %v1056_v3  ;;  %987 = vmatpush3.bf16.msra.mxu1 %v1057_v4  ;;  %v776_v3 = vrot.slane %v1156_v21, %v775_v2 }
 0x1bf   :  { %968 = vmatprep.subr.bf16.mxu0 %v1097_v0  ;;  %988 = vmatprep.subr.bf16.mxu1 %v1097_v0 }
 0x1c2   :  { %969 = vmatpush3.bf16.msra.mxu0 %v1058_v5  ;;  %989 = vmatpush3.bf16.msra.mxu1 %v1059_v6 }
 0x1c3   :  { %970 = vmatprep.subr.bf16.mxu0 %v1097_v0  ;;  %990 = vmatprep.subr.bf16.mxu1 %v1097_v0 }
 0x1c6   :  { %971 = vmatpush3.bf16.msra.mxu0 %v1060_v7  ;;  %991 = vmatpush3.bf16.msra.mxu1 %v1061_v8 }
 0x1c7   :  { %972 = vmatprep.subr.bf16.mxu0 %v1097_v0  ;;  %992 = vmatprep.subr.bf16.mxu1 %v1097_v0 }
 0x1ca   :  { %973 = vmatpush3.bf16.msra.mxu0 %v1062_v9  ;;  %993 = vmatpush3.bf16.msra.mxu1 %v1063_v10 }
 0x1cb   :  { %998 = vmatprep.subr.bf16.mxu0 %v1097_v0 }
 0x26d   :  { %v311_v15 = vpop.f32.mrf.mxu0  ;;  %v426_v16 = vpop.f32.mrf.mxu1 }
 0x26e   :  { %v322_v17 = vadd.f32 %v321_v13, %v311_v15  ;;  %v437_v18 = vadd.f32 %v436_v14, %v426_v16 }
 0x26f   :  { %v936_v20 = vpop.f32.mrf.mxu0  ;;  %v956_v22 = vpop.f32.mrf.mxu1 }
 0x270   :  { %v324_v25 = vmul.f32 0.01, %v322_v17  ;;  %v439_v26 = vmul.f32 0.01, %v437_v18 }
 0x271   :  { %v314_v23 = vpop.f32.mrf.mxu0  ;;  %v429_v24 = vpop.f32.mrf.mxu1 }
 0x272   :  { %v323_v27 = vadd.f32 %v321_v13, %v314_v23  ;;  %v438_v28 = vadd.f32 %v436_v14, %v429_v24  ;;  %v326_v33 = vmax.f32 %v322_v17, %v324_v25  ;;  %v441_v34 = vmax.f32 %v437_v18, %v439_v26 }
 0x273   :  { %v937_v29 = vpop.f32.mrf.mxu0  ;;  %v957_v30 = vpop.f32.mrf.mxu1 }
 0x274   :  { %v325_v31 = vmul.f32 0.01, %v323_v27  ;;  %v440_v32 = vmul.f32 0.01, %v438_v28 }
 0x276   :  { %v327_v35 = vmax.f32 %v323_v27, %v325_v31  ;;  %v442_v36 = vmax.f32 %v438_v28, %v440_v32 }
 0x278   :  { %v443_v38 = vpack.c.bf16 %v327_v35, %v326_v33  ;;  %v444_v39 = vpack.c.bf16 %v442_v36, %v441_v34 }
 0x27a   :  { %975 = vmatmul.mubr.bf16.vlgmr.msra.gmra.mxu0 %v443_v38  ;;  %995 = vmatmul.mubr.bf16.vlgmr.msra.gmra.mxu1 %v444_v39 }
 0x27b   :  { %999 = vmatpush3.bf16.msra.mxu0 %v1064_v37  ;;  %1014 = vmatprep.mubr.msk.bf16.mxu0 %vm1098_vm0, %v1097_v0 }
 0x27c   :  { %1000 = vmatprep.subr.bf16.mxu0 %v1097_v0 }
 0x27f   :  { %1001 = vmatpush3.bf16.msra.mxu0 %v1065_v40 }
 0x280   :  { %1002 = vmatprep.subr.bf16.mxu0 %v1097_v0 }
 0x283   :  { %1003 = vmatpush3.bf16.msra.mxu0 %v1066_v41 }
 0x284   :  { %1004 = vmatprep.subr.bf16.mxu0 %v1097_v0 }
 0x287   :  { %1005 = vmatpush3.bf16.msra.mxu0 %v1067_v42 }
 0x288   :  { %1006 = vmatprep.subr.bf16.mxu0 %v1097_v0 }
 0x28b   :  { %1007 = vmatpush3.bf16.msra.mxu0 %v1068_v43 }
 0x28c   :  { %1008 = vmatprep.subr.bf16.mxu0 %v1097_v0 }
 0x28f   :  { %1009 = vmatpush3.bf16.msra.mxu0 %v1069_v44 }
 0x290   :  { %1010 = vmatprep.subr.bf16.mxu0 %v1097_v0 }
 0x293   :  { %1011 = vmatpush3.bf16.msra.mxu0 %v1070_v45 }
 0x294   :  { %1012 = vmatprep.subr.bf16.mxu0 %v1097_v0 }
 0x297   :  { %1013 = vmatpush3.bf16.msra.mxu0 %v1071_v46 }
 0x33a   :  { %v543_v49 = vpop.f32.mrf.mxu0  ;;  %v654_v50 = vpop.f32.mrf.mxu1 }
 0x33b   :  { %v554_v51 = vadd.f32 %v553_v48, %v543_v49 }
 0x33c   :  { %v976_v52 = vpop.f32.mrf.mxu0  ;;  %v996_v53 = vpop.f32.mrf.mxu1 }
 0x33d   :  { %v661_v54 = vadd.f32 %v654_v50, %v554_v51 }
 0x33e   :  { %v546_v55 = vpop.f32.mrf.mxu0  ;;  %v657_v56 = vpop.f32.mrf.mxu1 }
 0x33f   :  { %v555_v57 = vadd.f32 %v553_v48, %v546_v55  ;;  %v663_v60 = vmul.f32 0.01, %v661_v54 }
 0x340   :  { %v977_v58 = vpop.f32.mrf.mxu0  ;;  %v997_v59 = vpop.f32.mrf.mxu1 }
 0x341   :  { %v662_v61 = vadd.f32 %v657_v56, %v555_v57  ;;  %v665_v62 = vmax.f32 %v661_v54, %v663_v60 }
 0x343   :  { %v664_v0 = vmul.f32 0.01, %v662_v61 }
 0x345   :  { %v666_v63 = vmax.f32 %v662_v61, %v664_v0 }
 0x347   :  { %v667_v1 = vpack.c.bf16 %v666_v63, %v665_v62 }
 0x349   :  { %1015 = vmatmul.mubr.bf16.vlgmr.msra.gmra.mxu0 %v667_v1 }
 0x409   :  { %v766_v4 = vpop.f32.mrf.mxu0 }
 0x40a   :  { %v777_v5 = vadd.f32 %v776_v3, %v766_v4 }
 0x40b   :  { %v1016_v6 = vpop.f32.mrf.mxu0 }
 0x40c   :  { %779 = vst [vmem:[%s1219_s3] sm:$0xff] %v777_v5 }
 0x40d   :  { %v769_v7 = vpop.f32.mrf.mxu0 }
 0x40e   :  { %v778_v8 = vadd.f32 %v776_v3, %v769_v7 }
 0x40f   :  { %v1017_v9 = vpop.f32.mrf.mxu0 }
 0x410   :  { %780 = vst [vmem:[%s1219_s3 + $0x8] sm:$0xff] %v778_v8 }
 0x411   :  { %785 = vsyncpa [#allocation3], 1 }

</bundles_post_ra>
